<compile_context>
chip_gen: v7x
topology: tpu7x:2x2x1
jax: 0.10.0
libtpu: 0.0.40
codegen_flags: <defaults>
</compile_context>

<pallas_src>
import jax
import jax.numpy as jnp
from jax.experimental import pallas as pl
from jax.experimental.pallas import tpu as pltpu


def _round_up(x: int, m: int) -> int:
    return (x + m - 1) // m * m


def gmf_kernel(uemb_ref, iemb_ref, w_ref, b_ref, out_ref):
    # uemb_ref / iemb_ref: (D_pad, tile_b) VMEM, batch on lanes (dense vregs)
    # w_ref: (D_pad, 1) f32 VMEM (constant block -> fetched once)
    # b_ref: (1,) f32 SMEM scalar
    # out_ref: (1, tile_b) f32 VMEM (lane-dense output row)
    u = uemb_ref[...].astype(jnp.float32)   # widen bf16 streams in-vreg only
    v = iemb_ref[...].astype(jnp.float32)
    w = w_ref[...]                           # (D_pad, 1) broadcasts along lanes

    prod = u * v                                             # VPU, lane-dense
    logit = jnp.sum(prod * w, axis=0, keepdims=True)         # sublane reduce -> (1, tile_b)
    logit = logit + b_ref[0]                                 # SMEM scalar bias

    # sigmoid via EUP exp + reciprocal (approx=False keeps full f32 accuracy;
    # the epilogue is only tile_b/128 dense vregs now, so it is not on the
    # critical path anyway).
    sig = pl.reciprocal(1.0 + jnp.exp(-logit), approx=False)
    out_ref[...] = sig.astype(out_ref.dtype)


def gmf_forward(uid, iid, user_table, item_table, fc_w, fc_b, *, tile_b=8192):
    B = uid.shape[0]
    D = user_table.shape[1]

    # Batch tile: multiple of 128 (lane granularity), clamped to padded batch.
    tile_b = int(max(128, min(_round_up(tile_b, 128), _round_up(B, 128))))
    Bp = _round_up(B, tile_b)
    nb = Bp // tile_b
    D_pad = _round_up(D, 8)                  # sublane granularity (f32)

    # Pad the tiny index vectors (index 0 is always valid) instead of padding
    # the gathered (B, D) streams -- avoids an extra O(B*D) HBM pass.
    if Bp != B:
        uid = jnp.pad(uid, (0, Bp - B))
        iid = jnp.pad(iid, (0, Bp - B))

    # --- XLA glue: embedding gather, presented batch-on-lanes (D, Bp). ---
    # TODO(synk): fuse this gather into the kernel via scalar-prefetched indices.
    u_t = jnp.take(user_table, uid, axis=0).T      # (D, Bp), table dtype kept
    i_t = jnp.take(item_table, iid, axis=0).T      # (D, Bp)
    if D_pad != D:
        u_t = jnp.pad(u_t, ((0, D_pad - D), (0, 0)))
        i_t = jnp.pad(i_t, ((0, D_pad - D), (0, 0)))

    # fc weight as a (D_pad, 1) f32 column (zero-padded rows contribute 0).
    w_col = jnp.zeros((D_pad, 1), jnp.float32).at[:D, 0].set(
        jnp.asarray(fc_w, jnp.float32).reshape(D))
    b_smem = jnp.asarray(fc_b, jnp.float32).reshape(1)

    # VMEM budget: 2 streams x 2 buffers x (D_pad, tile_b) + small extras.
    itemsize = jnp.dtype(u_t.dtype).itemsize
    buf_bytes = 2 * 2 * D_pad * tile_b * itemsize + 2 * tile_b * 4 + D_pad * 8
    vmem_limit = int(min(48 * 1024 * 1024, max(24 * 1024 * 1024, 2 * buf_bytes)))

    out = pl.pallas_call(
        gmf_kernel,
        out_shape=jax.ShapeDtypeStruct((nb, tile_b), jnp.float32),
        grid_spec=pltpu.PrefetchScalarGridSpec(
            num_scalar_prefetch=0,
            grid=(nb,),
            in_specs=[
                pl.BlockSpec((D_pad, tile_b), lambda i: (0, i)),       # user stream
                pl.BlockSpec((D_pad, tile_b), lambda i: (0, i)),       # item stream
                pl.BlockSpec((D_pad, 1), lambda i: (0, 0)),            # fc weight (constant block)
                pl.BlockSpec(memory_space=pltpu.MemorySpace.SMEM),     # fc bias scalar
            ],
            out_specs=pl.BlockSpec((1, tile_b), lambda i: (i, 0)),     # lane-dense row
        ),
        compiler_params=pltpu.CompilerParams(
            dimension_semantics=("parallel",),          # v7x: shard batch over 2 TCs
            vmem_limit_bytes=vmem_limit,
            allow_input_fusion=[True, True, False, False],  # hint; may be ignored by XLA
        ),
    )(u_t, i_t, w_col, b_smem)

    # (nb, tile_b) row-major == batch order; drop padding, return (B, 1).
    return out.reshape(Bp, 1)[:B]


if __name__ == "__main__":
    num_users, num_items, latent_dim = 50, 40, 32
    batch = 16

    key = jax.random.PRNGKey(0)
    k_u, k_i, k_w, k_uid, k_iid = jax.random.split(key, 5)

    # Mirrors _init_weight: N(0, 0.01) embeddings, zero bias, small fc weight.
    user_table = 0.01 * jax.random.normal(k_u, (num_users, latent_dim), jnp.float32)
    item_table = 0.01 * jax.random.normal(k_i, (num_items, latent_dim), jnp.float32)
    fc_w = (jax.random.normal(k_w, (latent_dim, 1), jnp.float32)
            / jnp.sqrt(latent_dim))                  # = torch fc.weight.T
    fc_b = jnp.zeros((1,), jnp.float32)

    uid = jax.random.randint(k_uid, (batch,), 0, num_users, dtype=jnp.int32)
    iid = jax.random.randint(k_iid, (batch,), 0, num_items, dtype=jnp.int32)

    def reference(u_idx, i_idx):
        return jax.nn.sigmoid((user_table[u_idx] * item_table[i_idx]) @ fc_w + fc_b)

    # Small demo batch (single tile).
    out = jax.block_until_ready(
        gmf_forward(uid, iid, user_table, item_table, fc_w, fc_b))
    assert out.shape == (batch, 1)
    assert jnp.allclose(out, reference(uid, iid), atol=1e-5, rtol=1e-5), \
        "mismatch vs reference (small batch)"

    # Multi-tile + padding path (batch not divisible by the tile).
    batch2 = 300
    k_uid2, k_iid2 = jax.random.split(k_iid)
    uid2 = jax.random.randint(k_uid2, (batch2,), 0, num_users, dtype=jnp.int32)
    iid2 = jax.random.randint(k_iid2, (batch2,), 0, num_items, dtype=jnp.int32)
    out2 = jax.block_until_ready(
        gmf_forward(uid2, iid2, user_table, item_table, fc_w, fc_b, tile_b=128))
    assert out2.shape == (batch2, 1)
    assert jnp.allclose(out2, reference(uid2, iid2), atol=1e-5, rtol=1e-5), \
        "mismatch vs reference (multi-tile)"

    # bf16 table path: HBM streams stay bf16, widened to f32 only in-vreg.
    out3 = jax.block_until_ready(
        gmf_forward(uid2, iid2,
                    user_table.astype(jnp.bfloat16),
                    item_table.astype(jnp.bfloat16),
                    fc_w, fc_b, tile_b=128))
    assert out3.shape == (batch2, 1)
    assert jnp.allclose(out3, reference(uid2, iid2), atol=5e-3, rtol=5e-3), \
        "mismatch vs reference (bf16 streams)"

    print("KERNEL_OK")
</pallas_src>

<mosaic_0001>
module attributes {stable_mosaic.version = 11 : i64} {
  func.func @gmf_kernel(%arg0: i32, %arg1: memref<32x128xf32, #tpu.memory_space<vmem>>, %arg2: memref<32x128xf32, #tpu.memory_space<vmem>>, %arg3: memref<32x1xf32, #tpu.memory_space<vmem>>, %arg4: memref<1xf32, #tpu.memory_space<smem>>, %arg5: memref<1x128xf32, #tpu.memory_space<vmem>>) attributes {dimension_semantics = [#tpu.dimension_semantics<parallel>], iteration_bounds = array<i64: 1>, scalar_prefetch = 0 : i64, scratch_operands = 0 : i64, tpu.core_type = #tpu.core_type<tc>, window_params = [{transform_indices = @transform_0, window_bounds = array<i64: 32, 128>}, {transform_indices = @transform_1, window_bounds = array<i64: 32, 128>}, {pipeline_mode = #tpu.pipeline_mode<synchronous>, transform_indices = @transform_2, window_bounds = array<i64: 32, 1>}, {transform_indices = @transform_3, window_bounds = array<i64: 1>}, {transform_indices = @transform_4, window_bounds = array<i64: 1, 128>}]} {
    %c0 = arith.constant 0 : index
    %c0_0 = arith.constant 0 : index
    %0 = vector.load %arg1[%c0, %c0_0] : memref<32x128xf32, #tpu.memory_space<vmem>>, vector<32x128xf32>
    %c0_1 = arith.constant 0 : index
    %c0_2 = arith.constant 0 : index
    %1 = vector.load %arg2[%c0_1, %c0_2] : memref<32x128xf32, #tpu.memory_space<vmem>>, vector<32x128xf32>
    %c0_3 = arith.constant 0 : index
    %c0_4 = arith.constant 0 : index
    %2 = vector.load %arg3[%c0_3, %c0_4] : memref<32x1xf32, #tpu.memory_space<vmem>>, vector<32x1xf32>
    %3 = arith.mulf %0, %1 : vector<32x128xf32>
    %4 = vector.broadcast %2 : vector<32x1xf32> to vector<32x128xf32>
    %5 = arith.mulf %3, %4 : vector<32x128xf32>
    %cst = arith.constant dense<0.000000e+00> : vector<128xf32>
    %6 = vector.multi_reduction <add>, %5, %cst [0] : vector<32x128xf32> to vector<128xf32>
    %7 = vector.shape_cast %6 : vector<128xf32> to vector<1x128xf32>
    %c0_5 = arith.constant 0 : index
    %8 = memref.load %arg4[%c0_5] : memref<1xf32, #tpu.memory_space<smem>>
    %9 = vector.broadcast %8 : f32 to vector<1x128xf32>
    %10 = arith.addf %7, %9 : vector<1x128xf32>
    %cst_6 = arith.constant 0.000000e+00 : f32
    %11 = vector.broadcast %cst_6 : f32 to vector<1x128xf32>
    %12 = arith.subf %11, %10 : vector<1x128xf32>
    %13 = math.exp %12 : vector<1x128xf32>
    %cst_7 = arith.constant 1.000000e+00 : f32
    %14 = vector.broadcast %cst_7 : f32 to vector<1x128xf32>
    %15 = arith.addf %14, %13 : vector<1x128xf32>
    %16 = tpu.reciprocal %15 : vector<1x128xf32> -> vector<1x128xf32>
    %c0_8 = arith.constant 0 : index
    %c0_9 = arith.constant 0 : index
    %17 = vector.load %arg5[%c0_8, %c0_9] : memref<1x128xf32, #tpu.memory_space<vmem>>, vector<1x128xf32>
    tpu.vector_store %arg5[%c0_8, %c0_9], %16 {strides = array<i32>} : memref<1x128xf32, #tpu.memory_space<vmem>>, vector<1x128xf32>,
    return
  }
  func.func @transform_0(%arg0: i32) -> (i32, i32) {
    %c0_i32 = arith.constant 0 : i32
    %c0_i32_0 = arith.constant 0 : i32
    return %c0_i32, %arg0 : i32, i32
  }
  func.func @transform_1(%arg0: i32) -> (i32, i32) {
    %c0_i32 = arith.constant 0 : i32
    %c0_i32_0 = arith.constant 0 : i32
    return %c0_i32, %arg0 : i32, i32
  }
  func.func @transform_2(%arg0: i32) -> (i32, i32) {
    %c0_i32 = arith.constant 0 : i32
    %c0_i32_0 = arith.constant 0 : i32
    %c0_i32_1 = arith.constant 0 : i32
    return %c0_i32, %c0_i32_0 : i32, i32
  }
  func.func @transform_3(%arg0: i32) -> i32 {
    %c0_i32 = arith.constant 0 : i32
    %c0_i32_0 = arith.constant 0 : i32
    return %c0_i32 : i32
  }
  func.func @transform_4(%arg0: i32) -> (i32, i32) {
    %c0_i32 = arith.constant 0 : i32
    %c0_i32_0 = arith.constant 0 : i32
    return %arg0, %c0_i32 : i32, i32
  }
}

</mosaic_0001>

<bundles_post_ra>
// kernel: tpu_custom_call.1
= control target key start
LH: loop header
LB: loop body
LE: loop exit
PB: predicated region body
PF: predicated region fallthrough
CT: control target
= control target key end

     0   :  { %10 = vsyncpa [#allocation4], 0  ;;  %s246_s0 = inlined_call_operand.vmem [shape: f32[32,128], index: 0, kind: input, shape index: {}]   ;;  %s247_s1 = inlined_call_operand.hbm [shape: f32[32,128], index: 1, kind: input, shape index: {}]   ;;  %s248_s2 = inlined_call_operand.vmem [shape: f32[32,1], index: 2, kind: input, shape index: {}]   ;;  %s249_s3 = inlined_call_operand.<no memory space> [shape: f32[1], index: 3, kind: input, shape index: {}]   ;;  %s250_s4 = inlined_call_operand.hbm [shape: f32[1,128], index: 4, kind: output, shape index: {}]  }
   0x1   :  { %11 = vsyncpa [#allocation5], 0  ;;  %s165_s15 = smov [#allocation3]   ;;  %s117_s19 = scalar_lea.hbm %s247_s1, 512 }
   0x2   :  { %s19_s16 = sshll.u32 %s165_s15, 4  ;;  %p118_p0 = scmp.ne.s32.totalorder %s247_s1, %s117_s19  ;;  %s20_s16 = int_to_ptr.vmem [resolvable:$true] %s19_s16 }
   0x3   :  { %p121_p1 = scmp.lt.u32.totalorder %s117_s19, %s247_s1 }
   0x5   :  { %p123_p2 = pnand %p121_p1, %p118_p0 }
   0x7   :  { %126 = shalt.err (!%p123_p2)
}
   0x8   :  { %s127_s24 = scalar_lea.vmem %s20_s16, 512  ;;  %p132_p4 = scmp.lt.s32.totalorder %s20_s16, %s20_s16 }
   0x9   :  { %p128_p3 = scmp.ne.s32.totalorder %s20_s16, %s127_s24  ;;  %p133_p5 = scmp.lt.s32.totalorder %s127_s24, %s127_s24 }
   0xb   :  { %p134_p6 = por %p133_p5, %p132_p4 }
   0xd   :  { %p135_p7 = pnand %p134_p6, %p128_p3 }
   0xf   :  { %138 = shalt.err (!%p135_p7)
}
  0x10   :  { %s166_s25 = smov 128   ;;  %s167_s26 = smov 8  }
  0x11   :  { %25 = dma.hbm_to_vmem [thread:$0]  %s247_s1, 512, %s20_s16, [#allocation4], %s166_s25, %s166_s25, %s167_s26  }
  0x12   :  { %161 = dma.done.wait [#allocation4], 512  }
  0x13   :  { %162 = vsyncadd [#allocation4], 4294966784  ;;  %v168_v0 = vmov 0   ;;  %v43_v1 = vld [vmem:[%s248_s2 + $0x10] sm:$0xff]  ;;  %v41_v2 = vld [vmem:[%s248_s2] sm:$0xff]  ;;  %v83_v33 = vstv %s249_s3 }
  0x14   :  { %112 = vset.pattern.permute.xlu1 %v168_v0  ;;  %111 = vset.pattern.permute.xlu0 %v168_v0  ;;  %v44_v3 = vld [vmem:[%s248_s2 + $0x18] sm:$0xff]  ;;  %v42_v4 = vld [vmem:[%s248_s2 + $0x8] sm:$0xff]  ;;  %v33_v5 = vld [vmem:[%s246_s0] sm:$0xff] }
  0x15   :  { %61 = vperm.xlu1 %112, %v43_v1   ;;  %51 = vperm.xlu0 %111, %v41_v2   ;;  %v37_v6 = vld [vmem:[#allocation3] sm:$0xff]  ;;  %v34_v7 = vld [vmem:[%s246_s0 + $0x8] sm:$0xff]  ;;  %v35_v10 = vld [vmem:[%s246_s0 + $0x10] sm:$0xff] }
  0x16   :  { %v38_v8 = vld [vmem:[#allocation3 + $0x8] sm:$0xff]  ;;  %v39_v11 = vld [vmem:[#allocation3 + $0x10] sm:$0xff]  ;;  %v45_v13 = vmul.f32 %v37_v6, %v33_v5  ;;  %v36_v15 = vld [vmem:[%s246_s0 + $0x18] sm:$0xff]  ;;  %s169_s0 = smov [#allocation6]  }
  0x17   :  { %v46_v14 = vmul.f32 %v38_v8, %v34_v7  ;;  %v40_v16 = vld [vmem:[#allocation3 + $0x18] sm:$0xff]  ;;  %v47_v17 = vmul.f32 %v39_v11, %v35_v10  ;;  %s97_s19 = sshll.u32 %s169_s0, 4  ;;  %s98_s19 = int_to_ptr.vmem [resolvable:$true] %s97_s19 }
  0x18   :  { %v48_v20 = vmul.f32 %v40_v16, %v36_v15  ;;  %s139_s20 = scalar_lea.vmem %s98_s19, 16  ;;  %s143_s21 = scalar_lea.vmem %s98_s19, 32 }
  0x19   :  { %66 = vperm.xlu1 %112, %v44_v3   ;;  %56 = vperm.xlu0 %111, %v42_v4   ;;  %p140_p8 = scmp.ne.s32.totalorder %s98_s19, %s139_s20  ;;  %p144_p9 = scmp.lt.s32.totalorder %s98_s19, %s98_s19 }
  0x1a   :  { %p145_p10 = scmp.lt.s32.totalorder %s143_s21, %s139_s20 }
  0x1c   :  { %p146_p11 = por %p145_p10, %p144_p9 }
  0x1e   :  { %p147_p12 = pnand %p146_p11, %p140_p8 }
  0x94   :  { %v62_v9 = vpop.permute.xlu1 %61  ;;  %v52_v12 = vpop.permute.xlu0 %51 }
  0x95   :  { %v69_v19 = vmul.f32 %v52_v12, %v45_v13  ;;  %v71_v23 = vmul.f32 %v62_v9, %v47_v17 }
  0x98   :  { %v57_v18 = vpop.permute.xlu0 %56  ;;  %v67_v22 = vpop.permute.xlu1 %66 }
  0x99   :  { %v70_v21 = vmul.f32 %v57_v18, %v46_v14  ;;  %v72_v25 = vmul.f32 %v67_v22, %v48_v20 }
  0x9b   :  { %v73_v24 = vadd.f32 %v70_v21, %v69_v19 }
  0x9d   :  { %v74_v26 = vadd.f32 %v73_v24, %v71_v23 }
  0x9f   :  { %v75_v27 = vadd.f32 %v74_v26, %v72_v25 }
  0xa1   :  { %v76_v28 = vrot.slane %v75_v27, 4 }
  0xa3   :  { %v77_v29 = vadd.f32 %v76_v28, %v75_v27 }
  0xa5   :  { %v78_v30 = vrot.slane %v77_v29, 2 }
  0xa7   :  { %v79_v31 = vadd.f32 %v78_v30, %v77_v29 }
  0xa9   :  { %v80_v32 = vrot.slane %v79_v31, 1 }
  0xab   :  { %v81_v34 = vadd.f32 %v80_v32, %v79_v31 }
  0xad   :  { %v84_v35 = vadd.f32 %v83_v33, %v81_v34 }
  0xaf   :  { %v85_v36 = vsub.f32 0.0, %v84_v35 }
  0xb1   :  { %v86_v37 = vmul.f32 1.442695, %v85_v36 }
  0xb3   :  { %113 = vpow2.f32 %v86_v37 }
  0xbd   :  { %v114_v38 = vpop.eup %113 }
  0xbe   :  { %v88_v39 = vadd.f32 1.0, %v114_v38 }
  0xc0   :  { %115 = vrcp.f32 %v88_v39 }
  0xca   :  { %v116_v40 = vpop.eup %115 }
  0xcb   :  { %90 = vst [vmem:[#allocation6] sm:$0x1] %v116_v40 }
  0xcc   :  { %150 = shalt.err (!%p147_p12)
}
  0xcd   :  { %s151_s23 = scalar_lea.hbm %s250_s4, 16 }
  0xce   :  { %p152_p13 = scmp.ne.s32.totalorder %s250_s4, %s151_s23  ;;  %p155_p0 = scmp.lt.u32.totalorder %s151_s23, %s250_s4 }
  0xd0   :  { %p157_p1 = pnand %p155_p0, %p152_p13 }
  0xd2   :  { %160 = shalt.err (!%p157_p1)
}
  0xd3   :  { %100 = dma.vmem_to_hbm [thread:$0]  %s98_s19, 16, %s250_s4, [#allocation5]  }
  0xd4   :  { %163 = dma.done.wait [#allocation5], 16  }
  0xd5   :  { %164 = vsyncadd [#allocation5], 4294967280 }
  0xd6   :  { %104 = vsyncpa [#allocation4], 1 }
  0xd7   :  { %105 = vsyncpa [#allocation5], 1 }

</bundles_post_ra>
